<compile_context>
chip_gen: v5e
topology: v5e:2x2
jax: 0.10.0
libtpu: 0.0.40
codegen_flags: <defaults>
</compile_context>

<pallas_src>
import functools

import jax
import jax.numpy as jnp
from jax import lax
from jax.experimental import pallas as pl
from jax.experimental.pallas import tpu as pltpu


def mlp_kernel(x_ref, w1_ref, b1_ref, w2_ref, b2_ref, w3_ref, b3_ref, o_ref):
    # x arrives in its native (TB, 14) layout (batch on sublanes). The first
    # matmul contracts the last dim of both W1 (32, 14) and x (TB, 14), so the
    # result is already lane-dense: batch on the 128-lane axis.
    x = x_ref[...]                                                   # (TB, 14)
    h1 = lax.dot_general(
        w1_ref[...], x,
        dimension_numbers=(((1,), (1,)), ((), ())),
        preferred_element_type=jnp.float32,
    )                                                                # (32, TB)
    h1 = jnp.maximum(h1 + b1_ref[...], 0.0)                          # ReLU
    h2 = jnp.dot(w2_ref[...], h1, preferred_element_type=jnp.float32)  # (16, TB)
    h2 = jnp.maximum(h2 + b2_ref[...], 0.0)                          # ReLU
    # Final out=1 layer on VPU + XLU (broadcast multiply + sublane reduce)
    # instead of an N=1 MXU matmul.
    h3 = jnp.sum(h2 * w3_ref[...], axis=0, keepdims=True)            # (1, TB)
    o_ref[...] = (h3 + b3_ref[...]).astype(o_ref.dtype)


@functools.partial(jax.jit, static_argnames=("tb", "min_steps"))
def linear_regression_forward(x, params, *, tb=16384, min_steps=8):
    """x: (B, 14) float32 -> (B, 1) float32 (matches the PyTorch module)."""
    assert tb % 128 == 0, "batch tile cap must be a multiple of the 128-lane width"
    B, F = x.shape

    w1, b1 = params["w1"], params["b1"]   # (32, 14), (32,)
    w2, b2 = params["w2"], params["b2"]   # (16, 32), (16,)
    w3, b3 = params["w3"], params["b3"]   # (1, 16),  (1,)

    # Bias columns / final-layer weight column broadcast across the lane
    # (batch) axis inside the kernel.
    b1c = b1.reshape(-1, 1)               # (32, 1)
    b2c = b2.reshape(-1, 1)               # (16, 1)
    w3c = w3.T                            # (16, 1)
    b3c = b3.reshape(1, 1)                # (1, 1)

    # ---- Batch tile selection ------------------------------------------------
    # Small batches: a single full-extent block (block dims equal to the array
    # dims, so no (8,128) divisibility requirement applies).
    # Large batches: TB is a multiple of 128 (lane-dense output stores), capped
    # by `tb`, and clamped so the grid has >= min_steps steps (megacore +
    # pipelining). The last x block may be ragged; Pallas pads it.
    if B < 128:
        TB = B
    else:
        lane_tiles = pl.cdiv(B, 128)                       # B in 128-lane units
        TB = 128 * max(1, min(tb // 128, pl.cdiv(lane_tiles, min_steps)))
    n_tiles = pl.cdiv(B, TB)
    Bp = TB * n_tiles                     # output allocated to a tile multiple

    const = lambda i: (0, 0)              # weights stay VMEM-resident

    # Explicit VMEM budget: the native-layout (TB, F) x block lane-pads to
    # (TB, 128) f32 in VMEM; the (1, TB) output block sublane-pads to (8, TB).
    # Both are double-buffered by the pipeline.
    x_buf = TB * 128 * 4
    o_buf = 8 * TB * 4
    vmem_limit = int(min(2 * (x_buf + o_buf) + (8 << 20), 112 << 20))

    out = pl.pallas_call(
        mlp_kernel,
        out_shape=jax.ShapeDtypeStruct((1, Bp), jnp.float32),
        grid_spec=pltpu.PrefetchScalarGridSpec(
            num_scalar_prefetch=0,
            grid=(n_tiles,),
            in_specs=[
                pl.BlockSpec((TB, F), lambda i: (i, 0)),   # x: native layout, streamed
                pl.BlockSpec(w1.shape, const),
                pl.BlockSpec(b1c.shape, const),
                pl.BlockSpec(w2.shape, const),
                pl.BlockSpec(b2c.shape, const),
                pl.BlockSpec(w3c.shape, const),
                pl.BlockSpec(b3c.shape, const),
            ],
            out_specs=pl.BlockSpec((1, TB), lambda i: (0, i)),
        ),
        compiler_params=pltpu.CompilerParams(
            dimension_semantics=("parallel",),   # shard batch across TCs (v7x)
            vmem_limit_bytes=vmem_limit,
        ),
    )(x, w1, b1c, w2, b2c, w3c, b3c)

    # (1, Bp) -> (B, 1): slice off padded columns; reshape (layout-identical),
    # no transpose op.
    return out[0, :B].reshape(B, 1)


def init_params(key):
    """Deterministic init with PyTorch nn.Linear shapes: W is (out, in)."""
    k1, k2, k3, k4, k5, k6 = jax.random.split(key, 6)

    def uinit(k, shape, fan_in):
        bound = 1.0 / jnp.sqrt(fan_in)
        return jax.random.uniform(k, shape, jnp.float32, -bound, bound)

    return {
        "w1": uinit(k1, (32, 14), 14.0),
        "b1": uinit(k2, (32,), 14.0),
        "w2": uinit(k3, (16, 32), 32.0),
        "b2": uinit(k4, (16,), 32.0),
        "w3": uinit(k5, (1, 16), 16.0),
        "b3": uinit(k6, (1,), 16.0),
    }


def reference_forward(x, p):
    h1 = jnp.maximum(x @ p["w1"].T + p["b1"], 0.0)
    h2 = jnp.maximum(h1 @ p["w2"].T + p["b2"], 0.0)
    return h2 @ p["w3"].T + p["b3"]


if __name__ == "__main__":
    key = jax.random.PRNGKey(0)
    kx, kp = jax.random.split(key)
    params = init_params(kp)

    # Small case (B=8): single full-extent block, grid of 1.
    x_small = jax.random.normal(kx, (8, 14), dtype=jnp.float32)
    out_small = jax.block_until_ready(linear_regression_forward(x_small, params))
    ref_small = reference_forward(x_small, params)
    assert out_small.shape == (8, 1), out_small.shape
    assert jnp.allclose(out_small, ref_small, atol=1e-5, rtol=1e-5), \
        "small-batch mismatch vs reference"

    # Case exercising the multi-step grid + ragged last x block
    # (B=600 -> TB=128, 5 grid steps, last block padded by Pallas).
    x_big = jax.random.normal(kx, (600, 14), dtype=jnp.float32)
    out_big = jax.block_until_ready(linear_regression_forward(x_big, params))
    ref_big = reference_forward(x_big, params)
    assert out_big.shape == (600, 1), out_big.shape
    assert jnp.allclose(out_big, ref_big, atol=1e-5, rtol=1e-5), \
        "gridded-batch mismatch vs reference"

    print("KERNEL_OK")
</pallas_src>

<mosaic_0001>
module attributes {stable_mosaic.version = 11 : i64} {
  func.func @mlp_kernel(%arg0: i32, %arg1: memref<8x14xf32, #tpu.memory_space<vmem>>, %arg2: memref<32x14xf32, #tpu.memory_space<vmem>>, %arg3: memref<32x1xf32, #tpu.memory_space<vmem>>, %arg4: memref<16x32xf32, #tpu.memory_space<vmem>>, %arg5: memref<16x1xf32, #tpu.memory_space<vmem>>, %arg6: memref<16x1xf32, #tpu.memory_space<vmem>>, %arg7: memref<1x1xf32, #tpu.memory_space<vmem>>, %arg8: memref<1x8xf32, #tpu.memory_space<vmem>>) attributes {dimension_semantics = [#tpu.dimension_semantics<parallel>], iteration_bounds = array<i64: 1>, scalar_prefetch = 0 : i64, scratch_operands = 0 : i64, tpu.core_type = #tpu.core_type<tc>, window_params = [{transform_indices = @transform_0, window_bounds = array<i64: 8, 14>}, {pipeline_mode = #tpu.pipeline_mode<synchronous>, transform_indices = @transform_1, window_bounds = array<i64: 32, 14>}, {pipeline_mode = #tpu.pipeline_mode<synchronous>, transform_indices = @transform_2, window_bounds = array<i64: 32, 1>}, {pipeline_mode = #tpu.pipeline_mode<synchronous>, transform_indices = @transform_3, window_bounds = array<i64: 16, 32>}, {pipeline_mode = #tpu.pipeline_mode<synchronous>, transform_indices = @transform_4, window_bounds = array<i64: 16, 1>}, {pipeline_mode = #tpu.pipeline_mode<synchronous>, transform_indices = @transform_5, window_bounds = array<i64: 16, 1>}, {pipeline_mode = #tpu.pipeline_mode<synchronous>, transform_indices = @transform_6, window_bounds = array<i64: 1, 1>}, {transform_indices = @transform_7, window_bounds = array<i64: 1, 8>}]} {
    %c0 = arith.constant 0 : index
    %c0_0 = arith.constant 0 : index
    %0 = vector.load %arg1[%c0, %c0_0] : memref<8x14xf32, #tpu.memory_space<vmem>>, vector<8x14xf32>
    %c0_1 = arith.constant 0 : index
    %c0_2 = arith.constant 0 : index
    %1 = vector.load %arg2[%c0_1, %c0_2] : memref<32x14xf32, #tpu.memory_space<vmem>>, vector<32x14xf32>
    %cst = arith.constant dense<0.000000e+00> : vector<32x8xf32>
    %2 = tpu.matmul %1, %0, %cst {dimension_numbers = #tpu.dot_dimension_numbers<[1], [1], [0], [0], [0, 0, 1, 0], [], []>} : vector<32x14xf32>, vector<8x14xf32>, vector<32x8xf32> -> vector<32x8xf32>
    %c0_3 = arith.constant 0 : index
    %c0_4 = arith.constant 0 : index
    %3 = vector.load %arg3[%c0_3, %c0_4] : memref<32x1xf32, #tpu.memory_space<vmem>>, vector<32x1xf32>
    %4 = vector.broadcast %3 : vector<32x1xf32> to vector<32x8xf32>
    %5 = arith.addf %2, %4 : vector<32x8xf32>
    %cst_5 = arith.constant 0.000000e+00 : f32
    %6 = vector.broadcast %cst_5 : f32 to vector<32x8xf32>
    %7 = arith.maximumf %5, %6 : vector<32x8xf32>
    %c0_6 = arith.constant 0 : index
    %c0_7 = arith.constant 0 : index
    %8 = vector.load %arg4[%c0_6, %c0_7] : memref<16x32xf32, #tpu.memory_space<vmem>>, vector<16x32xf32>
    %cst_8 = arith.constant dense<0.000000e+00> : vector<16x8xf32>
    %9 = tpu.matmul %8, %7, %cst_8 {dimension_numbers = #tpu.dot_dimension_numbers<[1], [0], [0], [1], [0, 0, 1, 1], [], []>} : vector<16x32xf32>, vector<32x8xf32>, vector<16x8xf32> -> vector<16x8xf32>
    %c0_9 = arith.constant 0 : index
    %c0_10 = arith.constant 0 : index
    %10 = vector.load %arg5[%c0_9, %c0_10] : memref<16x1xf32, #tpu.memory_space<vmem>>, vector<16x1xf32>
    %11 = vector.broadcast %10 : vector<16x1xf32> to vector<16x8xf32>
    %12 = arith.addf %9, %11 : vector<16x8xf32>
    %cst_11 = arith.constant 0.000000e+00 : f32
    %13 = vector.broadcast %cst_11 : f32 to vector<16x8xf32>
    %14 = arith.maximumf %12, %13 : vector<16x8xf32>
    %c0_12 = arith.constant 0 : index
    %c0_13 = arith.constant 0 : index
    %15 = vector.load %arg6[%c0_12, %c0_13] : memref<16x1xf32, #tpu.memory_space<vmem>>, vector<16x1xf32>
    %16 = vector.broadcast %15 : vector<16x1xf32> to vector<16x8xf32>
    %17 = arith.mulf %14, %16 : vector<16x8xf32>
    %cst_14 = arith.constant dense<0.000000e+00> : vector<8xf32>
    %18 = vector.multi_reduction <add>, %17, %cst_14 [0] : vector<16x8xf32> to vector<8xf32>
    %19 = vector.shape_cast %18 : vector<8xf32> to vector<1x8xf32>
    %c0_15 = arith.constant 0 : index
    %c0_16 = arith.constant 0 : index
    %20 = vector.load %arg7[%c0_15, %c0_16] : memref<1x1xf32, #tpu.memory_space<vmem>>, vector<1x1xf32>
    %21 = vector.broadcast %20 : vector<1x1xf32> to vector<1x8xf32>
    %22 = arith.addf %19, %21 : vector<1x8xf32>
    %c0_17 = arith.constant 0 : index
    %c0_18 = arith.constant 0 : index
    %23 = vector.load %arg8[%c0_17, %c0_18] : memref<1x8xf32, #tpu.memory_space<vmem>>, vector<1x8xf32>
    tpu.vector_store %arg8[%c0_17, %c0_18], %22 {strides = array<i32>} : memref<1x8xf32, #tpu.memory_space<vmem>>, vector<1x8xf32>,
    return
  }
  func.func @transform_0(%arg0: i32) -> (i32, i32) {
    %c0_i32 = arith.constant 0 : i32
    %c0_i32_0 = arith.constant 0 : i32
    return %arg0, %c0_i32 : i32, i32
  }
  func.func @transform_1(%arg0: i32) -> (i32, i32) {
    %c0_i32 = arith.constant 0 : i32
    %c0_i32_0 = arith.constant 0 : i32
    %c0_i32_1 = arith.constant 0 : i32
    return %c0_i32, %c0_i32_0 : i32, i32
  }
  func.func @transform_2(%arg0: i32) -> (i32, i32) {
    %c0_i32 = arith.constant 0 : i32
    %c0_i32_0 = arith.constant 0 : i32
    %c0_i32_1 = arith.constant 0 : i32
    return %c0_i32, %c0_i32_0 : i32, i32
  }
  func.func @transform_3(%arg0: i32) -> (i32, i32) {
    %c0_i32 = arith.constant 0 : i32
    %c0_i32_0 = arith.constant 0 : i32
    %c0_i32_1 = arith.constant 0 : i32
    return %c0_i32, %c0_i32_0 : i32, i32
  }
  func.func @transform_4(%arg0: i32) -> (i32, i32) {
    %c0_i32 = arith.constant 0 : i32
    %c0_i32_0 = arith.constant 0 : i32
    %c0_i32_1 = arith.constant 0 : i32
    return %c0_i32, %c0_i32_0 : i32, i32
  }
  func.func @transform_5(%arg0: i32) -> (i32, i32) {
    %c0_i32 = arith.constant 0 : i32
    %c0_i32_0 = arith.constant 0 : i32
    %c0_i32_1 = arith.constant 0 : i32
    return %c0_i32, %c0_i32_0 : i32, i32
  }
  func.func @transform_6(%arg0: i32) -> (i32, i32) {
    %c0_i32 = arith.constant 0 : i32
    %c0_i32_0 = arith.constant 0 : i32
    %c0_i32_1 = arith.constant 0 : i32
    return %c0_i32, %c0_i32_0 : i32, i32
  }
  func.func @transform_7(%arg0: i32) -> (i32, i32) {
    %c0_i32 = arith.constant 0 : i32
    %c0_i32_0 = arith.constant 0 : i32
    return %c0_i32, %arg0 : i32, i32
  }
}

</mosaic_0001>

<bundles_post_ra>
// kernel: linear_regression_forward.1
= control target key start
LH: loop header
LB: loop body
LE: loop exit
PB: predicated region body
PF: predicated region fallthrough
CT: control target
= control target key end

     0   :  { %s345_s0 = inlined_call_operand.vmem [shape: f32[8,14], index: 0, kind: input, shape index: {}]   ;;  %s346_s1 = inlined_call_operand.vmem [shape: f32[32,14], index: 1, kind: input, shape index: {}]   ;;  %s347_s2 = inlined_call_operand.vmem [shape: f32[32,1], index: 2, kind: input, shape index: {}]   ;;  %s348_s3 = inlined_call_operand.vmem [shape: f32[16,32], index: 3, kind: input, shape index: {}]   ;;  %s349_s4 = inlined_call_operand.vmem [shape: f32[16,1], index: 4, kind: input, shape index: {}]   ;;  %s350_s5 = inlined_call_operand.vmem [shape: f32[16,1], index: 5, kind: input, shape index: {}]   ;;  %s351_s6 = inlined_call_operand.<no memory space> [shape: f32[1,1], index: 6, kind: input, shape index: {}]   ;;  %s352_s7 = inlined_call_operand.hbm [shape: f32[1,8], index: 7, kind: output, shape index: {}]  }
   0x1   :  { %v12_v0 = vstv %s351_s6 }
   0x2   :  { %13 = vst [vmem:[#allocation2] sm:$0x1] %v12_v0 }
   0x3   :  { %v29_v1 = vld [vmem:[%s345_s0] sm:$0xff]  ;;  %vm58_vm0 = vcmask 113664   ;;  %v37_v2 = vld [vmem:[%s347_s2 + $0x18] sm:$0xff]  ;;  %v32_v3 = vld [vmem:[%s346_s1 + $0x10] sm:$0xff]  ;;  %v246_v6 = vmov 0  }
   0x4   :  { %210 = vmatpush.xpose.msk.msra.mxu2 %vm58_vm0, %v29_v1  ;;  %203 = vmatpush.xpose.msk.msra.mxu0 %vm58_vm0, %v29_v1  ;;  %v30_v4 = vld [vmem:[%s346_s1] sm:$0xff]  ;;  %v35_v5 = vld [vmem:[%s347_s2 + $0x8] sm:$0xff] }
   0x5   :  { %217 = vset.pattern.permute.xlu0 %v246_v6  ;;  %218 = vset.pattern.permute.xlu1 %v246_v6 }
   0x6   :  { %55 = vperm.xlu0 %217, %v37_v2   ;;  %45 = vperm.xlu1 %218, %v35_v5  }
   0x7   :  { %14 = vsyncpa [#allocation4], 0  ;;  %206 = vmatmul.msk.f32.vlgmr.msra.gmra.mxu2 %vm58_vm0, %v32_v3  ;;  %204 = vmatmul.msk.f32.vlgmr.msra.gmra.mxu0 %vm58_vm0, %v30_v4  ;;  %v36_v7 = vld [vmem:[%s347_s2 + $0x10] sm:$0xff]  ;;  %v34_v8 = vld [vmem:[%s347_s2] sm:$0xff]  ;;  %vm121_vm1 = vcmask 261120   ;;  %vm167_vm2 = vcmask 64512  }
   0x8   :  { %219 = vset.pattern.permute.xlu2 %v246_v6  ;;  %v33_v9 = vld [vmem:[%s346_s1 + $0x18] sm:$0xff]  ;;  %v31_v10 = vld [vmem:[%s346_s1 + $0x8] sm:$0xff]  ;;  %v153_v11 = vld [vmem:[%s350_s5] sm:$0xff]  ;;  %s194_s30 = sshll.u32 %s352_s7, 4  ;;  %vm185_vm3 = vcmask 57344   ;;  %s195_s30 = int_to_ptr.hbm [resolvable:$true] %s194_s30 }
   0x9   :  { %v154_v12 = vld [vmem:[%s350_s5 + $0x8] sm:$0xff]  ;;  %v109_v13 = vld [vmem:[%s349_s4] sm:$0xff] }
   0xa   :  { %113 = vperm.xlu2 %219, %v109_v13   ;;  %v110_v14 = vld [vmem:[%s349_s4 + $0x8] sm:$0xff]  ;;  %v177_v19 = vld [vmem:[#allocation2] sm:$0x1] }
   0xb   :  { %v107_v32 = vld [vmem:[%s348_s3] sm:$0xff]  ;;  %v108_v33 = vld [vmem:[%s348_s3 + $0x8] sm:$0xff]  ;;  %s247_s3 = smov [#allocation3]  }
   0xc   :  { %s192_s27 = sshll.u32 %s247_s3, 4  ;;  %s193_s27 = int_to_ptr.vmem [resolvable:$true] %s192_s27 }
   0xe   :  { %50 = vperm.xlu0 %217, %v36_v7   ;;  %40 = vperm.xlu1 %218, %v34_v8  }
   0xf   :  { %207 = vmatmul.msk.f32.gmra.mxu2 %vm58_vm0, %v33_v9  ;;  %205 = vmatmul.msk.f32.gmra.mxu0 %vm58_vm0, %v31_v10 }
  0x12   :  { %118 = vperm.xlu2 %219, %v110_v14  }
  0x16   :  { %157 = vperm.xlu0 %217, %v153_v11   ;;  %162 = vperm.xlu1 %218, %v154_v12  }
  0x1a   :  { %180 = vperm.xlu2 %219, %v177_v19  }
  0x64   :  { %v114_v34 = vpop.permute.xlu2 %113 }
  0x6c   :  { %v119_v38 = vpop.permute.xlu2 %118 }
  0x74   :  { %v181_v53 = vpop.permute.xlu2 %180 }
  0x75   :  { %v183_v55 = vperm.slane %v181_v53, 0 }
  0x78   :  { %v56_v15 = vpop.permute.xlu0 %55  ;;  %v46_v18 = vpop.permute.xlu1 %45 }
  0x80   :  { %v51_v20 = vpop.permute.xlu0 %50  ;;  %v41_v27 = vpop.permute.xlu1 %40 }
  0x84   :  { %v91_v16 = vpop.f32.mrf.mxu0 }
  0x85   :  { %v92_v28 = vadd.f32 %v91_v16, %v41_v27 }
  0x87   :  { %v103_v31 = vmax.f32 %v92_v28, 0.0 }
  0x88   :  { %v158_v41 = vpop.permute.xlu0 %157  ;;  %v163_v44 = vpop.permute.xlu1 %162 }
  0x8a   :  { %v97_v17 = vpop.f32.mrf.mxu2 }
  0x8b   :  { %v98_v23 = vadd.f32 %v97_v17, %v51_v20 }
  0x8c   :  { %v94_v21 = vpop.f32.mrf.mxu0 }
  0x8d   :  { %v95_v25 = vadd.f32 %v94_v21, %v46_v18  ;;  %v105_v29 = vmax.f32 %v98_v23, 0.0 }
  0x8f   :  { %v104_v30 = vmax.f32 %v95_v25, 0.0 }
  0x92   :  { %v100_v22 = vpop.f32.mrf.mxu2 }
  0x93   :  { %v101_v24 = vadd.f32 %v100_v22, %v56_v15 }
  0x95   :  { %v106_v26 = vmax.f32 %v101_v24, 0.0 }
  0x97   :  { %140 = vmatpush.msra.mxu1 %v106_v26  ;;  %211 = vmatpush.msra.mxu3 %v106_v26 }
  0x99   :  { %141 = vmatpush.msra.mxu1 %v105_v29  ;;  %212 = vmatpush.msra.mxu3 %v105_v29 }
  0x9b   :  { %142 = vmatpush.msra.mxu1 %v104_v30  ;;  %213 = vmatpush.msra.mxu3 %v104_v30 }
  0x9d   :  { %143 = vmatpush.msra.mxu1 %v103_v31  ;;  %214 = vmatpush.msra.mxu3 %v103_v31 }
  0x9e   :  { %208 = vmatmul.msk.f32.vlgmr.msra.gmra.mxu1 %vm121_vm1, %v107_v32  ;;  %209 = vmatmul.msk.f32.vlgmr.msra.gmra.mxu3 %vm121_vm1, %v108_v33 }
 0x11b   :  { %v145_v35 = vpop.f32.mrf.mxu1 }
 0x11c   :  { %v146_v36 = vadd.f32 %v145_v35, %v114_v34 }
 0x11e   :  { %v151_v37 = vmax.f32 %v146_v36, 0.0 }
 0x120   :  { %v165_v42 = vmul.f32 %v158_v41, %v151_v37 }
 0x121   :  { %v148_v39 = vpop.f32.mrf.mxu3 }
 0x122   :  { %v149_v40 = vadd.f32 %v148_v39, %v119_v38  ;;  %v168_v46 = vsel %vm167_vm2, %v165_v42, 0.0 }
 0x124   :  { %v152_v43 = vmax.f32 %v149_v40, 0.0 }
 0x126   :  { %v166_v45 = vmul.f32 %v163_v44, %v152_v43 }
 0x128   :  { %v169_v47 = vsel %vm167_vm2, %v166_v45, 0.0 }
 0x129   :  { %v170_v48 = vadd.f32 %v169_v47, %v168_v46 }
 0x12b   :  { %v171_v49 = vrot.slane %v170_v48, 4 }
 0x12d   :  { %v172_v50 = vadd.f32 %v171_v49, %v170_v48 }
 0x12f   :  { %v173_v51 = vrot.slane %v172_v50, 2 }
 0x131   :  { %v174_v52 = vadd.f32 %v173_v51, %v172_v50 }
 0x133   :  { %v175_v54 = vrot.slane %v174_v52, 1 }
 0x135   :  { %v176_v56 = vadd.f32 %v175_v54, %v174_v52 }
 0x137   :  { %v184_v57 = vadd.f32 %v183_v55, %v176_v56 }
 0x139   :  { %186 = vst.msk [vmem:[#allocation3] sm:$0x1] %vm185_vm3, %v184_v57 }
 0x13a   :  { %197 = dma.vmem_to_hbm [thread:$0]  %s193_s27, 16, %s195_s30, [#allocation4]  }
 0x13b   :  { %244 = dma.done.wait [#allocation4], 16  }
 0x13c   :  { %245 = vsyncadd [#allocation4], 4294967280 }
 0x13d   :  { %202 = vsyncpa [#allocation4], 1 }

</bundles_post_ra>
